<compile_context>
chip_gen: v6e
topology: v6e:2x2x1
jax: 0.10.0
libtpu: 0.0.40
codegen_flags: <defaults>
</compile_context>

<pallas_src>
import jax
import jax.numpy as jnp
from jax.experimental import pallas as pl
from jax.experimental.pallas import tpu as pltpu


def _tenenbaum_kernel(img_ref, out_ref, acc_ref):
    n = pl.program_id(0)

    @pl.when(n == 0)
    def _init():
        acc_ref[...] = jnp.zeros_like(acc_ref)

    x = img_ref[...]  # (BN, H, W)
    if x.dtype != jnp.float32:
        x = x.astype(jnp.float32)  # upcast in VMEM (free VPU filler); halves HBM for bf16
    _, H, W = x.shape

    # --- separable Sobel (factor 2 per filter folded into the wrapper weight) ---
    # Vertical (sublane) combination at full lane width W:
    a = x[:, 0:H - 2, :]
    b = x[:, 1:H - 1, :]
    c = x[:, 2:H, :]
    s = a + 2.0 * b + c          # -> Gx' = s[:, :, j] - s[:, :, j+2]
    d = a - c                    # -> Gy' = d[:, :, j] + 2*d[:, :, j+1] + d[:, :, j+2]

    # Horizontal (lane) combination on the half-combined data:
    gx = s[:, :, 0:W - 2] - s[:, :, 2:W]
    gy = d[:, :, 0:W - 2] + 2.0 * d[:, :, 1:W - 1] + d[:, :, 2:W]

    # Per-step partial: reduce only over the free batch axis (pure VPU adds);
    # the expensive cross-lane/sublane reduction is deferred to the last step.
    acc_ref[...] += jnp.sum(gx * gx + gy * gy, axis=0)

    @pl.when(n == pl.num_programs(0) - 1)
    def _finalize():
        out_ref[0, 0] = jnp.sum(acc_ref[...])


def tenenbaum(img: jax.Array, weight: float) -> jax.Array:
    """img: (N, 1, H, W). Returns scalar = sum(sobel(img)**2) * weight."""
    N, C, H, W = img.shape
    assert C == 1, "Tenenbaum expects a single input channel (like the PyTorch module)"
    assert H >= 3 and W >= 3, "3x3 'valid' Sobel needs H >= 3 and W >= 3"

    x = img.reshape(N, H, W)  # drop the size-1 channel dim (layout no-op)
    esize = jnp.dtype(x.dtype).itemsize

    # Batch-block size: largest divisor of N whose block stays within ~2 MiB
    # (x2 for double buffering), so per-step overhead is amortized.
    budget = 2 * 1024 * 1024
    bn = 1
    for cand in range(1, N + 1):
        if N % cand == 0 and cand * H * W * esize <= budget:
            bn = cand
    grid = (N // bn,)

    flops = 12 * N * (H - 2) * (W - 2)
    bytes_accessed = N * H * W * esize + 4

    acc = pl.pallas_call(
        _tenenbaum_kernel,
        out_shape=jax.ShapeDtypeStruct((1, 1), jnp.float32),
        grid=grid,
        in_specs=[pl.BlockSpec((bn, H, W), lambda n: (n, 0, 0))],
        out_specs=pl.BlockSpec((1, 1), lambda n: (0, 0), memory_space=pltpu.SMEM),
        scratch_shapes=[pltpu.VMEM((H - 2, W - 2), jnp.float32)],
        compiler_params=pltpu.CompilerParams(
            dimension_semantics=("arbitrary",),   # resident accumulator across grid
            vmem_limit_bytes=32 * 1024 * 1024,
        ),
        cost_estimate=pl.CostEstimate(
            flops=flops, transcendentals=0, bytes_accessed=bytes_accessed
        ),
    )(x)

    # Factored 2 out of each Sobel filter -> squared sum picks up a factor of 4.
    return acc[0, 0] * jnp.float32(4.0 * weight)


def _reference(img: jax.Array, weight: float) -> jax.Array:
    """Pure-JAX reference mirroring the PyTorch forward (for verification)."""
    Gx = jnp.array([[2.0, 0.0, -2.0], [4.0, 0.0, -4.0], [2.0, 0.0, -2.0]], jnp.float32)
    Gy = jnp.array([[2.0, 4.0, 2.0], [0.0, 0.0, 0.0], [-2.0, -4.0, -2.0]], jnp.float32)
    G = jnp.stack([Gx, Gy])[:, None, :, :]  # (2, 1, 3, 3)  OIHW
    out = jax.lax.conv_general_dilated(
        img.astype(jnp.float32), G, window_strides=(1, 1), padding="VALID",
        dimension_numbers=("NCHW", "OIHW", "NCHW"),
    )
    return jnp.sum(out ** 2) * jnp.float32(weight)


if __name__ == "__main__":
    key = jax.random.PRNGKey(0)
    N, C, H, W = 2, 1, 16, 16          # NCHW, single channel as the module requires
    img = jax.random.normal(key, (N, C, H, W), dtype=jnp.float32)
    weight = 0.5                        # deterministic regularizer weight

    result = jax.block_until_ready(tenenbaum(img, weight))
    ref = jax.block_until_ready(_reference(img, weight))
    assert jnp.allclose(result, ref, rtol=1e-5, atol=1e-3), (result, ref)

    print("KERNEL_OK")
</pallas_src>

<mosaic_0001>
module attributes {stable_mosaic.version = 11 : i64} {
  func.func @_tenenbaum_kernel(%arg0: i32, %arg1: memref<2x16x16xf32, #tpu.memory_space<vmem>>, %arg2: memref<1x1xf32, #tpu.memory_space<smem>>, %arg3: memref<14x14xf32, #tpu.memory_space<vmem>>) attributes {dimension_semantics = [#tpu.dimension_semantics<arbitrary>], iteration_bounds = array<i64: 1>, scalar_prefetch = 0 : i64, scratch_operands = 1 : i64, tpu.core_type = #tpu.core_type<tc>, window_params = [{transform_indices = @transform_0, window_bounds = array<i64: 2, 16, 16>}, {transform_indices = @transform_1, window_bounds = array<i64: 1, 1>}]} {
    %c0_i32 = arith.constant 0 : i32
    %0 = arith.cmpi eq, %arg0, %c0_i32 : i32
    %1 = arith.extui %0 : i1 to i32
    %c0_i32_0 = arith.constant 0 : i32
    %2 = arith.cmpi ne, %1, %c0_i32_0 : i32
    scf.if %2 {
      %cst_11 = arith.constant 0.000000e+00 : f32
      %32 = vector.broadcast %cst_11 : f32 to vector<14x14xf32>
      %c0_12 = arith.constant 0 : index
      %c0_13 = arith.constant 0 : index
      %33 = vector.load %arg3[%c0_12, %c0_13] : memref<14x14xf32, #tpu.memory_space<vmem>>, vector<14x14xf32>
      tpu.vector_store %arg3[%c0_12, %c0_13], %32 {strides = array<i32>} : memref<14x14xf32, #tpu.memory_space<vmem>>, vector<14x14xf32>,
    } else {
    }
    %c0 = arith.constant 0 : index
    %c0_1 = arith.constant 0 : index
    %c0_2 = arith.constant 0 : index
    %3 = vector.load %arg1[%c0, %c0_1, %c0_2] : memref<2x16x16xf32, #tpu.memory_space<vmem>>, vector<2x16x16xf32>
    %4 = vector.extract_strided_slice %3 {offsets = [0, 0, 0], sizes = [2, 14, 16], strides = [1, 1, 1]} : vector<2x16x16xf32> to vector<2x14x16xf32>
    %5 = vector.extract_strided_slice %3 {offsets = [0, 1, 0], sizes = [2, 14, 16], strides = [1, 1, 1]} : vector<2x16x16xf32> to vector<2x14x16xf32>
    %6 = vector.extract_strided_slice %3 {offsets = [0, 2, 0], sizes = [2, 14, 16], strides = [1, 1, 1]} : vector<2x16x16xf32> to vector<2x14x16xf32>
    %cst = arith.constant 2.000000e+00 : f32
    %7 = vector.broadcast %cst : f32 to vector<2x14x16xf32>
    %8 = arith.mulf %7, %5 : vector<2x14x16xf32>
    %9 = arith.addf %4, %8 : vector<2x14x16xf32>
    %10 = arith.addf %9, %6 : vector<2x14x16xf32>
    %11 = arith.subf %4, %6 : vector<2x14x16xf32>
    %12 = vector.extract_strided_slice %10 {offsets = [0, 0, 0], sizes = [2, 14, 14], strides = [1, 1, 1]} : vector<2x14x16xf32> to vector<2x14x14xf32>
    %13 = vector.extract_strided_slice %10 {offsets = [0, 0, 2], sizes = [2, 14, 14], strides = [1, 1, 1]} : vector<2x14x16xf32> to vector<2x14x14xf32>
    %14 = arith.subf %12, %13 : vector<2x14x14xf32>
    %15 = vector.extract_strided_slice %11 {offsets = [0, 0, 0], sizes = [2, 14, 14], strides = [1, 1, 1]} : vector<2x14x16xf32> to vector<2x14x14xf32>
    %16 = vector.extract_strided_slice %11 {offsets = [0, 0, 1], sizes = [2, 14, 14], strides = [1, 1, 1]} : vector<2x14x16xf32> to vector<2x14x14xf32>
    %cst_3 = arith.constant 2.000000e+00 : f32
    %17 = vector.broadcast %cst_3 : f32 to vector<2x14x14xf32>
    %18 = arith.mulf %17, %16 : vector<2x14x14xf32>
    %19 = arith.addf %15, %18 : vector<2x14x14xf32>
    %20 = vector.extract_strided_slice %11 {offsets = [0, 0, 2], sizes = [2, 14, 14], strides = [1, 1, 1]} : vector<2x14x16xf32> to vector<2x14x14xf32>
    %21 = arith.addf %19, %20 : vector<2x14x14xf32>
    %c0_4 = arith.constant 0 : index
    %c0_5 = arith.constant 0 : index
    %22 = vector.load %arg3[%c0_4, %c0_5] : memref<14x14xf32, #tpu.memory_space<vmem>>, vector<14x14xf32>
    %23 = arith.mulf %14, %14 : vector<2x14x14xf32>
    %24 = arith.mulf %21, %21 : vector<2x14x14xf32>
    %25 = arith.addf %23, %24 : vector<2x14x14xf32>
    %cst_6 = arith.constant dense<0.000000e+00> : vector<14x14xf32>
    %26 = vector.multi_reduction <add>, %25, %cst_6 [0] : vector<2x14x14xf32> to vector<14x14xf32>
    %27 = arith.addf %22, %26 : vector<14x14xf32>
    %c0_7 = arith.constant 0 : index
    %c0_8 = arith.constant 0 : index
    %28 = vector.load %arg3[%c0_7, %c0_8] : memref<14x14xf32, #tpu.memory_space<vmem>>, vector<14x14xf32>
    tpu.vector_store %arg3[%c0_7, %c0_8], %27 {strides = array<i32>} : memref<14x14xf32, #tpu.memory_space<vmem>>, vector<14x14xf32>,
    %c0_i32_9 = arith.constant 0 : i32
    %29 = arith.cmpi eq, %arg0, %c0_i32_9 : i32
    %30 = arith.extui %29 : i1 to i32
    %c0_i32_10 = arith.constant 0 : i32
    %31 = arith.cmpi ne, %30, %c0_i32_10 : i32
    scf.if %31 {
      %c0_11 = arith.constant 0 : index
      %c0_12 = arith.constant 0 : index
      %32 = vector.load %arg3[%c0_11, %c0_12] : memref<14x14xf32, #tpu.memory_space<vmem>>, vector<14x14xf32>
      %33 = vector.shape_cast %32 : vector<14x14xf32> to vector<1x14x14xf32>
      %cst_13 = arith.constant dense<0.000000e+00> : vector<1xf32>
      %34 = vector.multi_reduction <add>, %33, %cst_13 [1, 2] : vector<1x14x14xf32> to vector<1xf32>
      %35 = vector.shape_cast %34 : vector<1xf32> to vector<1x1x1xf32>
      %36 = vector.extract %35[0, 0, 0] : f32 from vector<1x1x1xf32>
      %c0_14 = arith.constant 0 : index
      %c0_15 = arith.constant 0 : index
      %37 = memref.load %arg2[%c0_14, %c0_15] : memref<1x1xf32, #tpu.memory_space<smem>>
      memref.store %36, %arg2[%c0_14, %c0_15] : memref<1x1xf32, #tpu.memory_space<smem>>
    } else {
    }
    return
  }
  func.func @transform_0(%arg0: i32) -> (i32, i32, i32) {
    %c0_i32 = arith.constant 0 : i32
    %c0_i32_0 = arith.constant 0 : i32
    %c0_i32_1 = arith.constant 0 : i32
    return %arg0, %c0_i32, %c0_i32_0 : i32, i32, i32
  }
  func.func @transform_1(%arg0: i32) -> (i32, i32) {
    %c0_i32 = arith.constant 0 : i32
    %c0_i32_0 = arith.constant 0 : i32
    %c0_i32_1 = arith.constant 0 : i32
    return %c0_i32, %c0_i32_0 : i32, i32
  }
}

</mosaic_0001>

<bundles_post_ra>
// kernel: tpu_custom_call.1
= control target key start
LH: loop header
LB: loop body
LE: loop exit
PB: predicated region body
PF: predicated region fallthrough
CT: control target
= control target key end

     0   :  { %6 = vsyncpa [#allocation4], 0  ;;  %s290_s0 = inlined_call_operand.hbm [shape: f32[2,16,16], index: 0, kind: input, shape index: {}]   ;;  %s291_s1 = inlined_call_operand.hbm [shape: f32[1,1], index: 1, kind: output, shape index: {}]  }
   0x1   :  { %7 = vsyncpa [#allocation5], 0  ;;  %s245_s6 = smov [#allocation3]  }
   0x2   :  { %s13_s7 = sshll.u32 %s245_s6, 4  ;;  %s14_s7 = int_to_ptr.vmem [resolvable:$true] %s13_s7 }
   0x3   :  { %s221_s8 = scalar_lea.vmem %s14_s7, 512  ;;  %p226_p1 = scmp.lt.s32.totalorder %s14_s7, %s14_s7 }
   0x4   :  { %p222_p0 = scmp.ne.s32.totalorder %s14_s7, %s221_s8  ;;  %p227_p2 = scmp.lt.s32.totalorder %s221_s8, %s221_s8 }
   0x6   :  { %p228_p3 = por %p227_p2, %p226_p1 }
   0x8   :  { %p229_p4 = pnand %p228_p3, %p222_p0 }
   0xa   :  { %232 = shalt.err (!%p229_p4)
}
   0xb   :  { %s246_s9 = smov 128   ;;  %s247_s10 = smov 8  }
   0xc   :  { %19 = dma.hbm_to_vmem [thread:$0]  %s290_s0, 512, %s14_s7, [#allocation4], %s246_s9, %s246_s9, %s247_s10  }
   0xd   :  { %241 = dma.done.wait [#allocation4], 512  }
   0xe   :  { %242 = vsyncadd [#allocation4], 4294966784  ;;  %v32_v0 = vld [vmem:[#allocation3 + $0x8] sm:$0xff]  ;;  %v31_v1 = vld [vmem:[#allocation3] sm:$0xff]  ;;  %vm62_vm0 = vcmask 1045504   ;;  %vm43_vm1 = vcmask 1046528  }
   0xf   :  { %v34_v2 = vld [vmem:[#allocation3 + $0x18] sm:$0xff]  ;;  %v64_v3 = vrot.slane %v32_v0, 2  ;;  %v63_v4 = vrot.slane %v31_v1, 2  ;;  %v33_v6 = vld [vmem:[#allocation3 + $0x10] sm:$0xff]  ;;  %v36_v7 = vmul.f32 2.0, %v32_v0  ;;  %v35_v9 = vmul.f32 2.0, %v31_v1 }
  0x10   :  { %v67_v5 = vrot.slane %v34_v2, 2  ;;  %v66_v8 = vrot.slane %v33_v6, 2  ;;  %v38_v10 = vmul.f32 2.0, %v34_v2  ;;  %v37_v11 = vmul.f32 2.0, %v33_v6  ;;  %s248_s0 = smov 126   ;;  %s249_s13 = smov 127  }
  0x11   :  { %v78_v12 = vsub.f32 %v32_v0, %v64_v3  ;;  %v65_v13 = vsel %vm62_vm0, %v63_v4, %v64_v3  ;;  %v45_v15 = vrot.slane %v36_v7, 1  ;;  %v44_v18 = vrot.slane %v35_v9, 1  ;;  %s251_s15 = smov [#allocation6]  }
  0x12   :  { %v80_v14 = vsub.f32 %v34_v2, %v67_v5  ;;  %v77_v16 = vsub.f32 %v31_v1, %v65_v13  ;;  %v68_v17 = vsel %vm62_vm0, %v66_v8, %v67_v5  ;;  %v48_v23 = vrot.slane %v38_v10, 1 }
  0x13   :  { %131 = vrot.lane.b32.xlu1 %v78_v12, %s248_s0  ;;  %v79_v20 = vsub.f32 %v33_v6, %v68_v17  ;;  %v102_v21 = vmul.f32 2.0, %v78_v12  ;;  %v46_v22 = vsel %vm43_vm1, %v44_v18, %v45_v15  ;;  %v47_v24 = vrot.slane %v37_v11, 1 }
  0x14   :  { %v104_v19 = vmul.f32 2.0, %v80_v14  ;;  %129 = vrot.lane.b32.xlu0 %v77_v16, %s248_s0  ;;  %vm29_vm2 = vcmask 111616   ;;  %v55_v26 = vadd.f32 %v45_v15, %v32_v0  ;;  %v250_v27 = vmov 0.0  }
  0x15   :  { %v103_v25 = vmul.f32 2.0, %v79_v20  ;;  %30 = vst.msk [vmem:[#allocation2 + $0x8] sm:$0x3f] %vm29_vm2, %v250_v27  ;;  %v101_v28 = vmul.f32 2.0, %v77_v16  ;;  %v54_v29 = vadd.f32 %v46_v22, %v31_v1  ;;  %vm27_vm3 = vcmask 113664  }
  0x16   :  { %v49_v30 = vsel %vm43_vm1, %v47_v24, %v48_v23  ;;  %28 = vst.msk [vmem:[#allocation2] sm:$0xff] %vm27_vm3, %v250_v27  ;;  %v74_v31 = vadd.f32 %v64_v3, %v55_v26  ;;  %v57_v32 = vadd.f32 %v48_v23, %v34_v2 }
  0x17   :  { %115 = vrot.lane.b32.xlu1 %v104_v19, %s249_s13  ;;  %v73_v33 = vadd.f32 %v65_v13, %v54_v29  ;;  %v56_v34 = vadd.f32 %v49_v30, %v33_v6 }
  0x18   :  { %111 = vrot.lane.b32.xlu0 %v102_v21, %s249_s13  ;;  %v76_v35 = vadd.f32 %v67_v5, %v57_v32 }
  0x19   :  { %v75_v36 = vadd.f32 %v68_v17, %v56_v34 }
  0x1b   :  { %113 = vrot.lane.b32.xlu1 %v103_v25, %s249_s13 }
  0x1c   :  { %109 = vrot.lane.b32.xlu0 %v101_v28, %s249_s13  ;;  %v146_v10 = vld [vmem:[#allocation2 + $0x8] sm:$0x3f] }
  0x1f   :  { %87 = vrot.lane.b32.xlu1 %v74_v31, %s248_s0 }
  0x20   :  { %85 = vrot.lane.b32.xlu0 %v73_v33, %s248_s0 }
  0x23   :  { %91 = vrot.lane.b32.xlu1 %v76_v35, %s248_s0 }
  0x24   :  { %89 = vrot.lane.b32.xlu0 %v75_v36, %s248_s0 }
  0x27   :  { %135 = vrot.lane.b32.xlu1 %v80_v14, %s248_s0 }
  0x28   :  { %133 = vrot.lane.b32.xlu0 %v79_v20, %s248_s0 }
  0x85   :  { %v132_v37 = vpop.permute.xlu1 %131 }
  0x86   :  { %v130_v38 = vpop.permute.xlu0 %129 }
  0x89   :  { %v116_v39 = vpop.permute.xlu1 %115 }
  0x8a   :  { %v112_v40 = vpop.permute.xlu0 %111  ;;  %v124_v53 = vadd.f32 %v116_v39, %v80_v14  ;;  %v145_v14 = vld [vmem:[#allocation2] sm:$0xff] }
  0x8b   :  { %v122_v44 = vadd.f32 %v112_v40, %v78_v12 }
  0x8d   :  { %v114_v41 = vpop.permute.xlu1 %113  ;;  %v142_v50 = vadd.f32 %v132_v37, %v122_v44 }
  0x8e   :  { %v110_v42 = vpop.permute.xlu0 %109  ;;  %v123_v56 = vadd.f32 %v114_v41, %v79_v20 }
  0x8f   :  { %v121_v46 = vadd.f32 %v110_v42, %v77_v16  ;;  %v152_v60 = vmul.f32 %v142_v50, %v142_v50 }
  0x91   :  { %v88_v43 = vpop.permute.xlu1 %87  ;;  %v141_v52 = vadd.f32 %v130_v38, %v121_v46 }
  0x92   :  { %v86_v45 = vpop.permute.xlu0 %85  ;;  %v98_v47 = vsub.f32 %v74_v31, %v88_v43 }
  0x93   :  { %v97_v48 = vsub.f32 %v73_v33, %v86_v45  ;;  %v151_v63 = vmul.f32 %v141_v52, %v141_v52 }
  0x94   :  { %v148_v54 = vmul.f32 %v98_v47, %v98_v47 }
  0x95   :  { %v92_v49 = vpop.permute.xlu1 %91  ;;  %v147_v57 = vmul.f32 %v97_v48, %v97_v48 }
  0x96   :  { %v90_v51 = vpop.permute.xlu0 %89  ;;  %v100_v55 = vsub.f32 %v76_v35, %v92_v49  ;;  %v156_v1 = vadd.f32 %v152_v60, %v148_v54 }
  0x97   :  { %v99_v58 = vsub.f32 %v75_v36, %v90_v51  ;;  %v155_v4 = vadd.f32 %v151_v63, %v147_v57 }
  0x98   :  { %v150_v2 = vmul.f32 %v100_v55, %v100_v55  ;;  %v164_v9 = vsel %vm29_vm2, %v156_v1, 0.0 }
  0x99   :  { %v136_v59 = vpop.permute.xlu1 %135  ;;  %v149_v5 = vmul.f32 %v99_v58, %v99_v58  ;;  %v160_v12 = vsel %vm27_vm3, %v155_v4, 0.0 }
  0x9a   :  { %v144_v61 = vadd.f32 %v136_v59, %v124_v53  ;;  %v134_v62 = vpop.permute.xlu0 %133 }
  0x9b   :  { %v143_v0 = vadd.f32 %v134_v62, %v123_v56 }
  0x9c   :  { %v154_v3 = vmul.f32 %v144_v61, %v144_v61 }
  0x9d   :  { %v153_v6 = vmul.f32 %v143_v0, %v143_v0 }
  0x9e   :  { %v158_v7 = vadd.f32 %v154_v3, %v150_v2 }
  0x9f   :  { %v157_v8 = vadd.f32 %v153_v6, %v149_v5 }
  0xa0   :  { %v165_v11 = vsel %vm29_vm2, %v158_v7, 0.0 }
  0xa1   :  { %v166_v13 = vadd.f32 %v165_v11, %v164_v9  ;;  %v161_v15 = vsel %vm27_vm3, %v157_v8, 0.0 }
  0xa2   :  { %v162_v16 = vadd.f32 %v161_v15, %v160_v12 }
  0xa3   :  { %v168_v17 = vadd.f32 %v166_v13, %v146_v10 }
  0xa4   :  { %v167_v18 = vadd.f32 %v162_v16, %v145_v14 }
  0xa5   :  { %170 = vst.msk [vmem:[#allocation2 + $0x8] sm:$0x3f] %vm29_vm2, %v168_v17 }
  0xa6   :  { %169 = vst.msk [vmem:[#allocation2] sm:$0xff] %vm27_vm3, %v167_v18 }
  0xac   :  { %v175_v19 = vld [vmem:[#allocation2 + $0x8] sm:$0x3f] }
  0xad   :  { %v174_v20 = vld [vmem:[#allocation2] sm:$0xff]  ;;  %v177_v21 = vsel %vm29_vm2, %v175_v19, 0.0 }
  0xae   :  { %v176_v22 = vsel %vm27_vm3, %v174_v20, 0.0 }
  0xaf   :  { %v178_v23 = vadd.f32 %v177_v21, %v176_v22 }
  0xb1   :  { %179 = vadd.xlane.f32.xlu0 %v178_v23 }
 0x13a   :  { %v180_v24 = vpop.xlane.xlu0 %179 }
 0x13b   :  { %v181_v25 = vrot.slane %v180_v24, 4 }
 0x13d   :  { %v182_v26 = vadd.f32 %v181_v25, %v180_v24 }
 0x13f   :  { %v183_v27 = vrot.slane %v182_v26, 2 }
 0x141   :  { %v184_v28 = vadd.f32 %v183_v27, %v182_v26 }
 0x143   :  { %v185_v29 = vrot.slane %v184_v28, 1 }
 0x145   :  { %v186_v30 = vadd.f32 %v185_v29, %v184_v28 }
 0x147   :  { %204 = vpush %v186_v30 }
 0x178   :  { %s205_s14 = spop %204 }
 0x179   :  { %189 = sst [smem:[#allocation6]] %s205_s14 }
 0x17a   :  { %197 = dma.smem_to_hbm %s251_s15, 16, %s291_s1, [#allocation5]  }
 0x17b   :  { %243 = dma.done.wait [#allocation5], 16  }
 0x17c   :  { %244 = vsyncadd [#allocation5], 4294967280 }
 0x17d   :  { %201 = sfence }
 0x17e   :  { %202 = vsyncpa [#allocation4], 1 }
 0x17f   :  { %203 = vsyncpa [#allocation5], 1 }

</bundles_post_ra>
